<compile_context>
chip_gen: v6e
topology: v6e:2x2x1
jax: 0.10.0
libtpu: 0.0.40
codegen_flags: <defaults>
</compile_context>

<pallas_src>
import math

import jax
import jax.numpy as jnp
from jax.experimental import pallas as pl
from jax.experimental.pallas import tpu as pltpu


# ---------------------------------------------------------------------------
# Pass 1: equalized 1x1 conv (W @ x tile) + bias + ReLU, accumulating per-image,
#         per-channel sum and sum-of-squares.  No activation written to HBM.
# ---------------------------------------------------------------------------
def _make_stats_kernel(tm, hw, needs_mask):
    def kernel(x_ref, w_ref, b_ref, sum_ref, sq_ref):
        j = pl.program_id(1)

        # (Cout, Cin)bf16 @ (Cin, tm)bf16 -> (Cout, tm)f32 accumulation on the MXU.
        y = jnp.dot(w_ref[...], x_ref[...], preferred_element_type=jnp.float32)
        y = jnp.maximum(y + b_ref[...], 0.0)      # bias (Cout,1) broadcasts over lanes

        if needs_mask:
            # Masked tail tile: zero out lanes past the true H*W extent so the OOB
            # (unspecified) padding of the last x block never reaches the stats.
            col = j * tm + jax.lax.broadcasted_iota(jnp.int32, (1, tm), 1)
            y = jnp.where(col < hw, y, 0.0)

        @pl.when(j == 0)                           # per-image accumulator init
        def _():
            sum_ref[...] = jnp.zeros_like(sum_ref)
            sq_ref[...] = jnp.zeros_like(sq_ref)

        sum_ref[...] += jnp.sum(y, axis=1, keepdims=True)   # lane reduce -> XLU slot
        sq_ref[...] += jnp.sum(y * y, axis=1, keepdims=True)

    return kernel


# ---------------------------------------------------------------------------
# Pass 2: recompute conv + bias + ReLU (cheaper than re-reading a stored y when
#         Cin is small) and apply BN as a fused multiply-add.
# ---------------------------------------------------------------------------
def _conv_relu_bn_kernel(x_ref, w_ref, b_ref, scale_ref, shift_ref, o_ref):
    y = jnp.dot(w_ref[...], x_ref[...], preferred_element_type=jnp.float32)
    y = jnp.maximum(y + b_ref[...], 0.0)
    o_ref[...] = (y * scale_ref[...] + shift_ref[...]).astype(o_ref.dtype)


# ---------------------------------------------------------------------------
# Tiling / VMEM helpers
# ---------------------------------------------------------------------------
def _vmem_limit_bytes():
    """Generation-aware scoped-VMEM limit (~3/4 of physical, capped at 96 MiB)."""
    try:
        cap = int(pltpu.get_tpu_info().vmem_capacity_bytes)
    except Exception:
        cap = 64 << 20   # conservative fallback (v7x per-TC size)
    return min((cap * 3) // 4, 96 << 20)


def _pick_tile(hw, bytes_per_col, budget_bytes, cap=2048):
    """Largest lane tile within budget.

    Returns (tm, needs_mask): tm is either the full row, a 128-multiple dividing hw,
    or (if no clean divisor exists) a 128-multiple cap with a masked tail tile.
    """
    budget_cols = max(128, budget_bytes // max(bytes_per_col, 1))
    cap = max(128, min(cap, (budget_cols // 128) * 128))
    if hw <= cap:
        return hw, False                         # full row: always layout-legal
    for t in range(cap, 127, -128):              # largest 128-multiple dividing hw
        if hw % t == 0:
            return t, False
    return cap, True                             # masked tail keeps tm in budget


# ---------------------------------------------------------------------------
# Forward
# ---------------------------------------------------------------------------
def conv_module_forward(x_nchw, weight, bias, *, eps=1e-5,
                        compute_dtype=jnp.bfloat16, out_dtype=jnp.float32,
                        tile_cap=2048):
    """ConvModule forward: equalized 1x1 conv + bias -> ReLU -> BatchNorm2d (training).

    x_nchw : (N, Cin, H, W) float32
    weight : (Cout, Cin, 1, 1) float32   (unscaled, like the PyTorch parameter)
    bias   : (Cout,) float32
    """
    N, Cin, H, W = x_nchw.shape
    Cout = weight.shape[0]
    HW = H * W
    M = N * HW

    # Equalized learning-rate scale: sqrt(2)/sqrt(fan_in), fan_in = 1*1*Cin.
    eq_scale = math.sqrt(2.0) / math.sqrt(1 * 1 * Cin)

    # NCHW is already (N, Cin, H*W)-contiguous: pure reshape, no transpose / no copy.
    # Matmul operands in bf16 (native MXU path, half the HBM traffic); everything
    # after the matmul stays f32.
    x3 = x_nchw.reshape(N, Cin, HW).astype(compute_dtype)
    w_mat = (weight.reshape(Cout, Cin).astype(jnp.float32) * eq_scale).astype(compute_dtype)
    b_col = bias.reshape(Cout, 1).astype(jnp.float32)

    in_itemsize = jnp.dtype(compute_dtype).itemsize
    out_itemsize = jnp.dtype(out_dtype).itemsize

    # VMEM budgeting: scoped limit minus resident operands (weight matrix, small
    # per-channel column vectors incl. lane padding) and some compiler slack.
    vmem_limit = _vmem_limit_bytes()
    col_pad_bytes = 4 * 128 * max(((Cout + 7) // 8) * 8, 8)     # one padded (Cout,1)
    resident = 2 * (in_itemsize * Cout * Cin) + 10 * col_pad_bytes + (2 << 20)
    tile_budget = max(vmem_limit - resident, 4 << 20)

    # Per-pass tile sizes: pass 1 double-buffers only x; pass 2 also the output tile.
    tm1, mask1 = _pick_tile(HW, 2 * in_itemsize * Cin, tile_budget, cap=tile_cap)
    tm2, _ = _pick_tile(HW, 2 * in_itemsize * Cin + 2 * out_itemsize * Cout,
                        tile_budget, cap=tile_cap)

    grid1 = (N, pl.cdiv(HW, tm1))
    grid2 = (N, pl.cdiv(HW, tm2))

    flops = 2 * M * Cin * Cout
    x_bytes = in_itemsize * N * Cin * HW
    w_bytes = in_itemsize * Cout * Cin
    out_bytes = out_itemsize * N * Cout * HW

    # ---- pass 1: per-image stats only (x read once, tiny accumulator outputs) -----
    # Batch axis is "parallel" (v7x megacore shards it); the spatial-tile axis is the
    # revisit/reduction axis, so it stays "arbitrary".
    psum, psq = pl.pallas_call(
        _make_stats_kernel(tm1, HW, mask1),
        out_shape=(
            jax.ShapeDtypeStruct((N, Cout, 1), jnp.float32),
            jax.ShapeDtypeStruct((N, Cout, 1), jnp.float32),
        ),
        grid_spec=pltpu.PrefetchScalarGridSpec(
            num_scalar_prefetch=0,
            grid=grid1,
            in_specs=[
                pl.BlockSpec((None, Cin, tm1), lambda n, j: (n, 0, j)),
                pl.BlockSpec((Cout, Cin), lambda n, j: (0, 0)),
                pl.BlockSpec((Cout, 1), lambda n, j: (0, 0)),
            ],
            out_specs=[
                pl.BlockSpec((None, Cout, 1), lambda n, j: (n, 0, 0)),
                pl.BlockSpec((None, Cout, 1), lambda n, j: (n, 0, 0)),
            ],
        ),
        compiler_params=pltpu.CompilerParams(
            dimension_semantics=("parallel", "arbitrary"),
            vmem_limit_bytes=vmem_limit),
        cost_estimate=pl.CostEstimate(
            flops=flops, transcendentals=0,
            bytes_accessed=x_bytes + w_bytes + 8 * N * Cout),
    )(x3, w_mat, b_col)

    # ---- tiny scalar glue: fold BN into one multiply-add --------------------------
    csum = jnp.sum(psum, axis=0)                          # (Cout, 1)
    csq = jnp.sum(psq, axis=0)                            # (Cout, 1)
    mean = csum / float(M)
    var = jnp.maximum(csq / float(M) - mean * mean, 0.0)  # clamp: no NaN from rsqrt
    invstd = jax.lax.rsqrt(var + eps)                     # gamma=1, beta=0 (defaults)
    bn_scale = invstd
    bn_shift = -mean * invstd

    # ---- pass 2: recompute conv+ReLU, apply BN, write NCHW-flattened output -------
    out3 = pl.pallas_call(
        _conv_relu_bn_kernel,
        out_shape=jax.ShapeDtypeStruct((N, Cout, HW), out_dtype),
        grid_spec=pltpu.PrefetchScalarGridSpec(
            num_scalar_prefetch=0,
            grid=grid2,
            in_specs=[
                pl.BlockSpec((None, Cin, tm2), lambda n, j: (n, 0, j)),
                pl.BlockSpec((Cout, Cin), lambda n, j: (0, 0)),
                pl.BlockSpec((Cout, 1), lambda n, j: (0, 0)),
                pl.BlockSpec((Cout, 1), lambda n, j: (0, 0)),
                pl.BlockSpec((Cout, 1), lambda n, j: (0, 0)),
            ],
            out_specs=pl.BlockSpec((None, Cout, tm2), lambda n, j: (n, 0, j)),
        ),
        compiler_params=pltpu.CompilerParams(
            dimension_semantics=("parallel", "parallel"),     # megacore-shardable
            vmem_limit_bytes=vmem_limit),
        cost_estimate=pl.CostEstimate(
            flops=flops + 3 * M * Cout, transcendentals=0,
            bytes_accessed=x_bytes + w_bytes + out_bytes),
    )(x3, w_mat, b_col, bn_scale, bn_shift)

    # Free reshape: (N, Cout, H*W) is already NCHW-flattened.
    return out3.reshape(N, Cout, H, W)


# ---------------------------------------------------------------------------
# Pure-JAX reference mirroring the PyTorch forward (training-mode BN).  The conv
# uses the same bf16 operands / f32 accumulation as the kernel so the comparison
# isolates kernel errors rather than bf16 rounding of the inputs.
# ---------------------------------------------------------------------------
def _reference(x_nchw, weight, bias, eps=1e-5, compute_dtype=jnp.bfloat16):
    N, Cin, H, W = x_nchw.shape
    Cout = weight.shape[0]
    scale = math.sqrt(2.0) / math.sqrt(Cin)
    w = (weight.reshape(Cout, Cin).astype(jnp.float32) * scale).astype(compute_dtype)
    xb = x_nchw.astype(compute_dtype)
    y = jnp.einsum("nchw,oc->nohw", xb, w,
                   preferred_element_type=jnp.float32) + bias.reshape(1, Cout, 1, 1)
    y = jnp.maximum(y, 0.0)
    mean = jnp.mean(y, axis=(0, 2, 3), keepdims=True)
    var = jnp.mean((y - mean) ** 2, axis=(0, 2, 3), keepdims=True)
    return (y - mean) / jnp.sqrt(var + eps)


if __name__ == "__main__":
    key = jax.random.PRNGKey(0)
    kx, kw = jax.random.split(key)

    N, Cin, Cout, Hs, Ws = 2, 4, 8, 16, 16
    x = jax.random.normal(kx, (N, Cin, Hs, Ws), dtype=jnp.float32)

    # Parameters initialized as in __init__: weight ~ N(0,1), bias = 0.
    weight = jax.random.normal(kw, (Cout, Cin, 1, 1), dtype=jnp.float32)
    bias = jnp.zeros((Cout,), dtype=jnp.float32)

    out = conv_module_forward(x, weight, bias)
    out = jax.block_until_ready(out)

    ref = _reference(x, weight, bias)
    assert out.shape == (N, Cout, Hs, Ws)
    assert jnp.allclose(out, ref, atol=1e-2, rtol=1e-2), float(
        jnp.max(jnp.abs(out - ref)))

    print("KERNEL_OK")
</pallas_src>

<mosaic_0001>
module attributes {stable_mosaic.version = 11 : i64} {
  func.func @kernel(%arg0: i32, %arg1: i32, %arg2: memref<1x4x256xbf16, #tpu.memory_space<vmem>>, %arg3: memref<8x4xbf16, #tpu.memory_space<vmem>>, %arg4: memref<8x1xf32, #tpu.memory_space<vmem>>, %arg5: memref<1x8x1xf32, #tpu.memory_space<vmem>>, %arg6: memref<1x8x1xf32, #tpu.memory_space<vmem>>) attributes {dimension_semantics = [#tpu.dimension_semantics<parallel>, #tpu.dimension_semantics<arbitrary>], iteration_bounds = array<i64: 2, 1>, scalar_prefetch = 0 : i64, scratch_operands = 0 : i64, tpu.core_type = #tpu.core_type<tc>, window_params = [{transform_indices = @transform_0, window_bounds = array<i64: 1, 4, 256>}, {pipeline_mode = #tpu.pipeline_mode<synchronous>, transform_indices = @transform_1, window_bounds = array<i64: 8, 4>}, {pipeline_mode = #tpu.pipeline_mode<synchronous>, transform_indices = @transform_2, window_bounds = array<i64: 8, 1>}, {transform_indices = @transform_3, window_bounds = array<i64: 1, 8, 1>}, {transform_indices = @transform_4, window_bounds = array<i64: 1, 8, 1>}]} {
    %c0 = arith.constant 0 : index
    %c0_0 = arith.constant 0 : index
    %0 = vector.load %arg3[%c0, %c0_0] : memref<8x4xbf16, #tpu.memory_space<vmem>>, vector<8x4xbf16>
    %c0_1 = arith.constant 0 : index
    %c0_2 = arith.constant 0 : index
    %c0_3 = arith.constant 0 : index
    %1 = vector.load %arg2[%c0_1, %c0_2, %c0_3] : memref<1x4x256xbf16, #tpu.memory_space<vmem>>, vector<1x4x256xbf16>
    %2 = vector.shape_cast %1 : vector<1x4x256xbf16> to vector<4x256xbf16>
    %cst = arith.constant dense<0.000000e+00> : vector<8x256xf32>
    %3 = tpu.matmul %0, %2, %cst {dimension_numbers = #tpu.dot_dimension_numbers<[1], [0], [0], [1], [0, 0, 1, 1], [], []>} : vector<8x4xbf16>, vector<4x256xbf16>, vector<8x256xf32> -> vector<8x256xf32>
    %c0_4 = arith.constant 0 : index
    %c0_5 = arith.constant 0 : index
    %4 = vector.load %arg4[%c0_4, %c0_5] : memref<8x1xf32, #tpu.memory_space<vmem>>, vector<8x1xf32>
    %5 = vector.broadcast %4 : vector<8x1xf32> to vector<8x256xf32>
    %6 = arith.addf %3, %5 : vector<8x256xf32>
    %cst_6 = arith.constant 0.000000e+00 : f32
    %7 = vector.broadcast %cst_6 : f32 to vector<8x256xf32>
    %8 = arith.maximumf %6, %7 : vector<8x256xf32>
    %c0_i32 = arith.constant 0 : i32
    %9 = arith.cmpi eq, %arg1, %c0_i32 : i32
    %10 = arith.extui %9 : i1 to i32
    %c0_i32_7 = arith.constant 0 : i32
    %11 = arith.cmpi ne, %10, %c0_i32_7 : i32
    scf.if %11 {
      %cst_22 = arith.constant 0.000000e+00 : f32
      %29 = vector.broadcast %cst_22 : f32 to vector<8x1xf32>
      %c0_23 = arith.constant 0 : index
      %c0_24 = arith.constant 0 : index
      %c0_25 = arith.constant 0 : index
      %30 = vector.load %arg5[%c0_23, %c0_24, %c0_25] : memref<1x8x1xf32, #tpu.memory_space<vmem>>, vector<1x8x1xf32>
      %31 = vector.shape_cast %30 : vector<1x8x1xf32> to vector<8x1xf32>
      %32 = vector.shape_cast %29 : vector<8x1xf32> to vector<1x8x1xf32>
      tpu.vector_store %arg5[%c0_23, %c0_24, %c0_25], %32 {strides = array<i32>} : memref<1x8x1xf32, #tpu.memory_space<vmem>>, vector<1x8x1xf32>,
      %cst_26 = arith.constant 0.000000e+00 : f32
      %33 = vector.broadcast %cst_26 : f32 to vector<8x1xf32>
      %c0_27 = arith.constant 0 : index
      %c0_28 = arith.constant 0 : index
      %c0_29 = arith.constant 0 : index
      %34 = vector.load %arg6[%c0_27, %c0_28, %c0_29] : memref<1x8x1xf32, #tpu.memory_space<vmem>>, vector<1x8x1xf32>
      %35 = vector.shape_cast %34 : vector<1x8x1xf32> to vector<8x1xf32>
      %36 = vector.shape_cast %33 : vector<8x1xf32> to vector<1x8x1xf32>
      tpu.vector_store %arg6[%c0_27, %c0_28, %c0_29], %36 {strides = array<i32>} : memref<1x8x1xf32, #tpu.memory_space<vmem>>, vector<1x8x1xf32>,
    } else {
    }
    %c0_8 = arith.constant 0 : index
    %c0_9 = arith.constant 0 : index
    %c0_10 = arith.constant 0 : index
    %12 = vector.load %arg5[%c0_8, %c0_9, %c0_10] : memref<1x8x1xf32, #tpu.memory_space<vmem>>, vector<1x8x1xf32>
    %13 = vector.shape_cast %12 : vector<1x8x1xf32> to vector<8x1xf32>
    %cst_11 = arith.constant dense<0.000000e+00> : vector<8xf32>
    %14 = vector.multi_reduction <add>, %8, %cst_11 [1] : vector<8x256xf32> to vector<8xf32>
    %15 = vector.shape_cast %14 : vector<8xf32> to vector<8x1xf32>
    %16 = arith.addf %13, %15 : vector<8x1xf32>
    %c0_12 = arith.constant 0 : index
    %c0_13 = arith.constant 0 : index
    %c0_14 = arith.constant 0 : index
    %17 = vector.load %arg5[%c0_12, %c0_13, %c0_14] : memref<1x8x1xf32, #tpu.memory_space<vmem>>, vector<1x8x1xf32>
    %18 = vector.shape_cast %17 : vector<1x8x1xf32> to vector<8x1xf32>
    %19 = vector.shape_cast %16 : vector<8x1xf32> to vector<1x8x1xf32>
    tpu.vector_store %arg5[%c0_12, %c0_13, %c0_14], %19 {strides = array<i32>} : memref<1x8x1xf32, #tpu.memory_space<vmem>>, vector<1x8x1xf32>,
    %c0_15 = arith.constant 0 : index
    %c0_16 = arith.constant 0 : index
    %c0_17 = arith.constant 0 : index
    %20 = vector.load %arg6[%c0_15, %c0_16, %c0_17] : memref<1x8x1xf32, #tpu.memory_space<vmem>>, vector<1x8x1xf32>
    %21 = vector.shape_cast %20 : vector<1x8x1xf32> to vector<8x1xf32>
    %22 = arith.mulf %8, %8 : vector<8x256xf32>
    %cst_18 = arith.constant dense<0.000000e+00> : vector<8xf32>
    %23 = vector.multi_reduction <add>, %22, %cst_18 [1] : vector<8x256xf32> to vector<8xf32>
    %24 = vector.shape_cast %23 : vector<8xf32> to vector<8x1xf32>
    %25 = arith.addf %21, %24 : vector<8x1xf32>
    %c0_19 = arith.constant 0 : index
    %c0_20 = arith.constant 0 : index
    %c0_21 = arith.constant 0 : index
    %26 = vector.load %arg6[%c0_19, %c0_20, %c0_21] : memref<1x8x1xf32, #tpu.memory_space<vmem>>, vector<1x8x1xf32>
    %27 = vector.shape_cast %26 : vector<1x8x1xf32> to vector<8x1xf32>
    %28 = vector.shape_cast %25 : vector<8x1xf32> to vector<1x8x1xf32>
    tpu.vector_store %arg6[%c0_19, %c0_20, %c0_21], %28 {strides = array<i32>} : memref<1x8x1xf32, #tpu.memory_space<vmem>>, vector<1x8x1xf32>,
    return
  }
  func.func @transform_0(%arg0: i32, %arg1: i32) -> (i32, i32, i32) {
    %c0_i32 = arith.constant 0 : i32
    %c0_i32_0 = arith.constant 0 : i32
    return %arg0, %c0_i32, %arg1 : i32, i32, i32
  }
  func.func @transform_1(%arg0: i32, %arg1: i32) -> (i32, i32) {
    %c0_i32 = arith.constant 0 : i32
    %c0_i32_0 = arith.constant 0 : i32
    %c0_i32_1 = arith.constant 0 : i32
    return %c0_i32, %c0_i32_0 : i32, i32
  }
  func.func @transform_2(%arg0: i32, %arg1: i32) -> (i32, i32) {
    %c0_i32 = arith.constant 0 : i32
    %c0_i32_0 = arith.constant 0 : i32
    %c0_i32_1 = arith.constant 0 : i32
    return %c0_i32, %c0_i32_0 : i32, i32
  }
  func.func @transform_3(%arg0: i32, %arg1: i32) -> (i32, i32, i32) {
    %c0_i32 = arith.constant 0 : i32
    %c0_i32_0 = arith.constant 0 : i32
    %c0_i32_1 = arith.constant 0 : i32
    return %arg0, %c0_i32, %c0_i32_0 : i32, i32, i32
  }
  func.func @transform_4(%arg0: i32, %arg1: i32) -> (i32, i32, i32) {
    %c0_i32 = arith.constant 0 : i32
    %c0_i32_0 = arith.constant 0 : i32
    %c0_i32_1 = arith.constant 0 : i32
    return %arg0, %c0_i32, %c0_i32_0 : i32, i32, i32
  }
}

</mosaic_0001>

<bundles_post_ra>
// kernel: tpu_custom_call.1
= control target key start
LH: loop header
LB: loop body
LE: loop exit
PB: predicated region body
PF: predicated region fallthrough
CT: control target
= control target key end

     0   :  { %s520_s15 = smov 0   ;;  %s522_s16 = smov 0   ;;  %s570_s0 = inlined_call_operand.vmem [shape: bf16[2,4,256], index: 0, kind: input, shape index: {}]   ;;  %s571_s1 = inlined_call_operand.vmem [shape: bf16[8,4], index: 1, kind: input, shape index: {}]   ;;  %s572_s2 = inlined_call_operand.vmem [shape: f32[8,1], index: 2, kind: input, shape index: {}]   ;;  %s573_s3 = inlined_call_operand.vmem [shape: f32[2,8,1], index: 3, kind: output, shape index: {0}]   ;;  %s574_s4 = inlined_call_operand.vmem [shape: f32[2,8,1], index: 4, kind: output, shape index: {1}]  }
   0x1   :  { %s524_s17 = smov 0  }
   0x2 LB: > { %s27_s18 = sadd.s32 1, %s487_s16  ;;  %p431_p0 = scmp.ge.s32.totalorder %s491_s17, 1  ;;  %s491_s17 = sphi %s524_s17, %s15_s17   ;;  %s487_s16 = sphi %s522_s16, %s576_s16   ;;  %s483_s15 = sphi %s520_s15, %s575_s15  }
   0x3   : > { %p29_p1 = scmp.ge.s32.totalorder %s27_s18, 2  ;;  %p184_p2 = scmp.lt.s32.totalorder %s491_s17, 3 }
   0x5   : > { %s578_s18 = smov (%p29_p1, %s27_s18), 0  ;;  %p185_p3 = pnand %p431_p0, %p184_p2 }
   0x6   : > { %p218_p4 = scmp.lt.s32.totalorder (!%p185_p3), %s483_s15, 1 }
   0x7   : > { %188 = sbr.rel (%p185_p3) target bundleno = 366 (0x16e), region = 32 }
   0xc   : > { %v493_v0 = vmov 0   ;;  %v238_v1 = vld [vmem:[%s572_s2] sm:$0xff]  ;;  %s580_s15 = smov (!%p218_p4, %s483_s15), 1  ;;  %vm257_vm0 = vcmask 1041408   ;;  %vm253_vm1 = vcmask 31744   ;;  %vm311_vm2 = vcmask 7168  }
   0xd   : > { %296 = vmatprep.mubr.bf16.mxu0 %v493_v0  ;;  %468 = vset.pattern.permute.xlu0 %v493_v0  ;;  %s441_s21 = sshll.u32 %s580_s15, 2  ;;  %v236_v5 = vld [vmem:[%s571_s1] sm:$0xf]  ;;  %s434_s27 = sshll.u32 %s580_s15, 3  ;;  %v494_v6 = vmov 0.0  }
   0xe   : > { %241 = vperm.xlu0 %468, %v238_v1   ;;  %s225_s24 = scalar_lea.vmem %s570_s0, %s441_s21  ;;  %s230_s30 = scalar_lea.vmem %s573_s3, %s434_s27 }
   0xf   : > { %v436_v2 = vld.sshfl [vmem:[%s225_s24] sm:$0x33 pattern:$0x76325410]  ;;  %312 = vst.msk [vmem:[%s230_s30] sm:$0xff] %vm311_vm2, %v494_v6  ;;  %s234_s7 = scalar_lea.vmem %s574_s4, %s434_s27 }
  0x10   : > { %v252_v3 = vcombine.high %v436_v2, %v436_v2  ;;  %v259_v4 = vsel %vm257_vm0, %v436_v2, 0  ;;  %313 = vst.msk [vmem:[%s234_s7] sm:$0xff] %vm311_vm2, %v494_v6 }
  0x12   : > { %437 = vmatprep.subr.msk.bf16.mxu0 %vm257_vm0, %v252_v3 }
  0x13   : > { %279 = vmatpush1.bf16.msra.mxu0 %v259_v4 }
  0x16   : > { %438 = vmatmul.mubr.msk.bf16.vlgmr.msra.gmra.mxu0 %vm253_vm1, %v236_v5  ;;  %v314_v20 = vld [vmem:[%s230_s30] sm:$0xff] }
  0x17   : > { %v321_v22 = vld [vmem:[%s234_s7] sm:$0xff] }
  0x89   : > { %v242_v7 = vpop.permute.xlu0 %241 }
  0xd6   : > { %v298_v8 = vpop.f32.mrf.mxu0 }
  0xd7   : > { %v299_v9 = vadd.f32 %v298_v8, %v242_v7 }
  0xd8   : > { %v300_v10 = vpop.f32.mrf.mxu0 }
  0xd9   : > { %v305_v11 = vmax.f32 %v299_v9, 0.0  ;;  %v301_v12 = vadd.f32 %v300_v10, %v242_v7 }
  0xda   : > { %v302_v13 = vpop.f32.mrf.mxu0 }
  0xdb   : > { %v306_v14 = vmax.f32 %v301_v12, 0.0  ;;  %v322_v17 = vmul.f32 %v305_v11, %v305_v11 }
  0xdc   : > { %v303_v15 = vpop.f32.mrf.mxu0 }
  0xdd   : > { %v315_v16 = vadd.f32 %v306_v14, %v305_v11  ;;  %v323_v18 = vmul.f32 %v306_v14, %v306_v14 }
  0xdf   : > { %316 = vadd.xlane.f32.xlu0 %v315_v16  ;;  %v324_v19 = vadd.f32 %v323_v18, %v322_v17 }
  0xe1   : > { %325 = vadd.xlane.f32.xlu1 %v324_v19 }
 0x168   : > { %v317_v21 = vpop.xlane.xlu0 %316 }
 0x169   : > { %v318_v23 = vadd.f32 %v317_v21, %v314_v20 }
 0x16a   : > { %v326_v24 = vpop.xlane.xlu1 %325 }
 0x16b   : > { %320 = vst.msk [vmem:[%s230_s30] sm:$0xff] %vm311_vm2, %v318_v23  ;;  %v327_v25 = vadd.f32 %v326_v24, %v321_v22 }
 0x16d   : > { %328 = vst.msk [vmem:[%s234_s7] sm:$0xff] %vm311_vm2, %v327_v25 }
 0x16e PF: > { %s15_s17 = sadd.s32 1, %s491_s17   ;;  %s575_s15 = smov %s487_s16 }
 0x16f   : > { %p12_p5 = scmp.ge.s32.totalorder %s15_s17, 4   ;;  %s576_s16 = smov %s578_s18 }
 0x171   :  { %14 = sbr.rel (!%p12_p5) target bundleno = 2 (0x2), region = 78 }

</bundles_post_ra>
